<compile_context>
chip_gen: v6e
topology: v6e:2x2x1
jax: 0.10.0
libtpu: 0.0.40
codegen_flags: <defaults>
</compile_context>

<pallas_src>
import functools

import jax
import jax.numpy as jnp
from jax.experimental import pallas as pl
from jax.experimental.pallas import tpu as pltpu

LANE = 128          # vreg lane width
TARGET_ROWS = 1024  # 1024x128 f32 block = 512 KiB per input


def _round_up(x, m):
    return ((x + m - 1) // m) * m


def _iou_sums_kernel(x_ref, t_ref, score_ref, acc_xt, acc_sum,
                     *, tm, rows_last, smooth):
    """Grid = (N, num_chunks). Accumulate per-sample sums; emit IoU score on last chunk.

    x_ref, t_ref : (1, tm, LANE) tiles of one sample's flattened features
    score_ref    : (1, 1, LANE) f32 output (per-sample IoU score, lane-broadcast)
    acc_xt       : (8, LANE) f32 accumulator for sum(x * t)
    acc_sum      : (8, LANE) f32 accumulator for sum(x) + sum(t)  (== sum(x + t))
    """
    c = pl.program_id(1)
    nc = pl.num_programs(1)

    @pl.when(c == 0)
    def _():
        acc_xt[...] = jnp.zeros_like(acc_xt)
        acc_sum[...] = jnp.zeros_like(acc_sum)

    x = x_ref[0].astype(jnp.float32)   # (tm, LANE)
    t = t_ref[0].astype(jnp.float32)

    if rows_last != tm:
        # Ragged final chunk (static condition): zero rows past the valid
        # range so DMA-padded garbage never enters the sums.
        valid = jnp.where(c == nc - 1, rows_last, tm)
        row = jax.lax.broadcasted_iota(jnp.int32, (tm, LANE), 0)
        keep = row < valid
        x = jnp.where(keep, x, 0.0)
        t = jnp.where(keep, t, 0.0)

    def fold(v):
        # (tm, LANE) -> (8, LANE): splits the sublane axis into whole (8,128)
        # vregs and adds them elementwise -- pure VPU, no XLU reduction.
        return v.reshape(tm // 8, 8, LANE).sum(axis=0)

    acc_xt[...] += fold(x * t)
    acc_sum[...] += fold(x + t)

    @pl.when(c == nc - 1)
    def _():
        s_xt = jnp.sum(acc_xt[...])     # cross-lane reduce: once per sample
        s_sum = jnp.sum(acc_sum[...])
        score = (s_xt + smooth) / (s_sum - s_xt + smooth)
        score_ref[...] = jnp.full((1, 1, LANE), score, jnp.float32)


def iou_loss(inputs, targets, smooth=1.0):
    """Equivalent of IoULoss()(inputs, targets)."""
    assert inputs.shape == targets.shape
    n = inputs.shape[0]
    d = 1
    for s in inputs.shape[1:]:
        d *= s

    # Keep native dtype (cast happens in-kernel after the load).
    x = inputs.reshape(n, d)
    t = targets.reshape(n, d)

    # Pack features lane-dense: (N, R, 128). Zero-padding the lane tail (only
    # when D is not a multiple of 128) is exactly neutral for all three sums.
    r = pl.cdiv(d, LANE)
    lane_pad = r * LANE - d
    if lane_pad:
        x = jnp.pad(x, ((0, 0), (0, lane_pad)))
        t = jnp.pad(t, ((0, 0), (0, lane_pad)))
    x = x.reshape(n, r, LANE)
    t = t.reshape(n, r, LANE)

    # Sublane granularity of the input dtype (f32: 8, bf16: 16, 8-bit: 32).
    gran = max(8, 32 // jnp.dtype(inputs.dtype).itemsize)
    tm = min(_round_up(TARGET_ROWS, gran), _round_up(r, gran))
    num_chunks = pl.cdiv(r, tm)
    rows_last = r - (num_chunks - 1) * tm  # valid rows in the final (maybe partial) chunk

    kernel = functools.partial(_iou_sums_kernel, tm=tm, rows_last=rows_last,
                               smooth=float(smooth))

    scores = pl.pallas_call(
        kernel,
        out_shape=jax.ShapeDtypeStruct((n, 1, LANE), jnp.float32),
        grid_spec=pltpu.PrefetchScalarGridSpec(
            num_scalar_prefetch=0,
            grid=(n, num_chunks),
            in_specs=[
                pl.BlockSpec((1, tm, LANE), lambda b, c: (b, c, 0)),
                pl.BlockSpec((1, tm, LANE), lambda b, c: (b, c, 0)),
            ],
            out_specs=pl.BlockSpec((1, 1, LANE), lambda b, c: (b, 0, 0)),
            scratch_shapes=[
                pltpu.VMEM((8, LANE), jnp.float32),
                pltpu.VMEM((8, LANE), jnp.float32),
            ],
        ),
        compiler_params=pltpu.CompilerParams(
            # Batch axis is independent (shardable across TensorCores);
            # chunk axis is the per-sample reduction.
            dimension_semantics=("parallel", "arbitrary"),
        ),
    )(x, t)

    per_sample_score = scores[:, 0, 0]
    return 1.0 - jnp.sum(per_sample_score) / n


def _reference_iou_loss(inputs, targets, smooth=1.0):
    n = inputs.shape[0]
    m1 = inputs.reshape(n, -1).astype(jnp.float32)
    m2 = targets.reshape(n, -1).astype(jnp.float32)
    inter = jnp.sum(m1 * m2, axis=1)
    score = (inter + smooth) / (jnp.sum(m1, axis=1) + jnp.sum(m2, axis=1) - inter + smooth)
    return 1.0 - jnp.sum(score) / n


if __name__ == "__main__":
    key = jax.random.PRNGKey(0)
    k1, k2 = jax.random.split(key)

    # NCHW: batch=2, channels=4, spatial=16x16
    shape = (2, 4, 16, 16)
    inputs = jax.nn.sigmoid(jax.random.normal(k1, shape, dtype=jnp.float32))  # probabilities
    targets = jax.random.bernoulli(k2, 0.5, shape).astype(jnp.float32)        # binary masks

    loss = iou_loss(inputs, targets)
    loss = jax.block_until_ready(loss)

    ref = _reference_iou_loss(inputs, targets)
    assert jnp.allclose(loss, ref, rtol=1e-5, atol=1e-5), (loss, ref)

    print("KERNEL_OK")
</pallas_src>

<mosaic_0001>
module attributes {stable_mosaic.version = 11 : i64} {
  func.func @_iou_sums_kernel(%arg0: i32, %arg1: i32, %arg2: memref<1x8x128xf32, #tpu.memory_space<vmem>>, %arg3: memref<1x8x128xf32, #tpu.memory_space<vmem>>, %arg4: memref<1x1x128xf32, #tpu.memory_space<vmem>>, %arg5: memref<8x128xf32, #tpu.memory_space<vmem>>, %arg6: memref<8x128xf32, #tpu.memory_space<vmem>>) attributes {dimension_semantics = [#tpu.dimension_semantics<parallel>, #tpu.dimension_semantics<arbitrary>], iteration_bounds = array<i64: 2, 1>, scalar_prefetch = 0 : i64, scratch_operands = 2 : i64, tpu.core_type = #tpu.core_type<tc>, window_params = [{transform_indices = @transform_0, window_bounds = array<i64: 1, 8, 128>}, {transform_indices = @transform_1, window_bounds = array<i64: 1, 8, 128>}, {transform_indices = @transform_2, window_bounds = array<i64: 1, 1, 128>}]} {
    %c0_i32 = arith.constant 0 : i32
    %0 = arith.cmpi eq, %arg1, %c0_i32 : i32
    %1 = arith.extui %0 : i1 to i32
    %c0_i32_0 = arith.constant 0 : i32
    %2 = arith.cmpi ne, %1, %c0_i32_0 : i32
    scf.if %2 {
      %cst_17 = arith.constant 0.000000e+00 : f32
      %22 = vector.broadcast %cst_17 : f32 to vector<8x128xf32>
      %c0_18 = arith.constant 0 : index
      %c0_19 = arith.constant 0 : index
      %23 = vector.load %arg5[%c0_18, %c0_19] : memref<8x128xf32, #tpu.memory_space<vmem>>, vector<8x128xf32>
      tpu.vector_store %arg5[%c0_18, %c0_19], %22 {strides = array<i32>} : memref<8x128xf32, #tpu.memory_space<vmem>>, vector<8x128xf32>,
      %cst_20 = arith.constant 0.000000e+00 : f32
      %24 = vector.broadcast %cst_20 : f32 to vector<8x128xf32>
      %c0_21 = arith.constant 0 : index
      %c0_22 = arith.constant 0 : index
      %25 = vector.load %arg6[%c0_21, %c0_22] : memref<8x128xf32, #tpu.memory_space<vmem>>, vector<8x128xf32>
      tpu.vector_store %arg6[%c0_21, %c0_22], %24 {strides = array<i32>} : memref<8x128xf32, #tpu.memory_space<vmem>>, vector<8x128xf32>,
    } else {
    }
    %c0 = arith.constant 0 : index
    %c0_1 = arith.constant 0 : index
    %c0_2 = arith.constant 0 : index
    %3 = vector.load %arg2[%c0, %c0_1, %c0_2] : memref<1x8x128xf32, #tpu.memory_space<vmem>>, vector<1x8x128xf32>
    %4 = vector.shape_cast %3 : vector<1x8x128xf32> to vector<8x128xf32>
    %c0_3 = arith.constant 0 : index
    %c0_4 = arith.constant 0 : index
    %c0_5 = arith.constant 0 : index
    %5 = vector.load %arg3[%c0_3, %c0_4, %c0_5] : memref<1x8x128xf32, #tpu.memory_space<vmem>>, vector<1x8x128xf32>
    %6 = vector.shape_cast %5 : vector<1x8x128xf32> to vector<8x128xf32>
    %c0_6 = arith.constant 0 : index
    %c0_7 = arith.constant 0 : index
    %7 = vector.load %arg5[%c0_6, %c0_7] : memref<8x128xf32, #tpu.memory_space<vmem>>, vector<8x128xf32>
    %8 = arith.mulf %4, %6 : vector<8x128xf32>
    %9 = vector.shape_cast %8 : vector<8x128xf32> to vector<1x8x128xf32>
    %cst = arith.constant dense<0.000000e+00> : vector<8x128xf32>
    %10 = vector.multi_reduction <add>, %9, %cst [0] : vector<1x8x128xf32> to vector<8x128xf32>
    %11 = arith.addf %7, %10 : vector<8x128xf32>
    %c0_8 = arith.constant 0 : index
    %c0_9 = arith.constant 0 : index
    %12 = vector.load %arg5[%c0_8, %c0_9] : memref<8x128xf32, #tpu.memory_space<vmem>>, vector<8x128xf32>
    tpu.vector_store %arg5[%c0_8, %c0_9], %11 {strides = array<i32>} : memref<8x128xf32, #tpu.memory_space<vmem>>, vector<8x128xf32>,
    %c0_10 = arith.constant 0 : index
    %c0_11 = arith.constant 0 : index
    %13 = vector.load %arg6[%c0_10, %c0_11] : memref<8x128xf32, #tpu.memory_space<vmem>>, vector<8x128xf32>
    %14 = arith.addf %4, %6 : vector<8x128xf32>
    %15 = vector.shape_cast %14 : vector<8x128xf32> to vector<1x8x128xf32>
    %cst_12 = arith.constant dense<0.000000e+00> : vector<8x128xf32>
    %16 = vector.multi_reduction <add>, %15, %cst_12 [0] : vector<1x8x128xf32> to vector<8x128xf32>
    %17 = arith.addf %13, %16 : vector<8x128xf32>
    %c0_13 = arith.constant 0 : index
    %c0_14 = arith.constant 0 : index
    %18 = vector.load %arg6[%c0_13, %c0_14] : memref<8x128xf32, #tpu.memory_space<vmem>>, vector<8x128xf32>
    tpu.vector_store %arg6[%c0_13, %c0_14], %17 {strides = array<i32>} : memref<8x128xf32, #tpu.memory_space<vmem>>, vector<8x128xf32>,
    %c0_i32_15 = arith.constant 0 : i32
    %19 = arith.cmpi eq, %arg1, %c0_i32_15 : i32
    %20 = arith.extui %19 : i1 to i32
    %c0_i32_16 = arith.constant 0 : i32
    %21 = arith.cmpi ne, %20, %c0_i32_16 : i32
    scf.if %21 {
      %c0_17 = arith.constant 0 : index
      %c0_18 = arith.constant 0 : index
      %22 = vector.load %arg5[%c0_17, %c0_18] : memref<8x128xf32, #tpu.memory_space<vmem>>, vector<8x128xf32>
      %23 = vector.shape_cast %22 : vector<8x128xf32> to vector<1x8x128xf32>
      %cst_19 = arith.constant dense<0.000000e+00> : vector<1xf32>
      %24 = vector.multi_reduction <add>, %23, %cst_19 [1, 2] : vector<1x8x128xf32> to vector<1xf32>
      %25 = vector.shape_cast %24 : vector<1xf32> to vector<1x1x1xf32>
      %26 = vector.extract %25[0, 0, 0] : f32 from vector<1x1x1xf32>
      %c0_20 = arith.constant 0 : index
      %c0_21 = arith.constant 0 : index
      %27 = vector.load %arg6[%c0_20, %c0_21] : memref<8x128xf32, #tpu.memory_space<vmem>>, vector<8x128xf32>
      %28 = vector.shape_cast %27 : vector<8x128xf32> to vector<1x8x128xf32>
      %cst_22 = arith.constant dense<0.000000e+00> : vector<1xf32>
      %29 = vector.multi_reduction <add>, %28, %cst_22 [1, 2] : vector<1x8x128xf32> to vector<1xf32>
      %30 = vector.shape_cast %29 : vector<1xf32> to vector<1x1x1xf32>
      %31 = vector.extract %30[0, 0, 0] : f32 from vector<1x1x1xf32>
      %cst_23 = arith.constant 1.000000e+00 : f32
      %32 = arith.addf %26, %cst_23 : f32
      %33 = arith.subf %31, %26 : f32
      %cst_24 = arith.constant 1.000000e+00 : f32
      %34 = arith.addf %33, %cst_24 : f32
      %35 = arith.divf %32, %34 : f32
      %36 = vector.broadcast %35 : f32 to vector<1x1x128xf32>
      %c0_25 = arith.constant 0 : index
      %c0_26 = arith.constant 0 : index
      %c0_27 = arith.constant 0 : index
      %37 = vector.load %arg4[%c0_25, %c0_26, %c0_27] : memref<1x1x128xf32, #tpu.memory_space<vmem>>, vector<1x1x128xf32>
      tpu.vector_store %arg4[%c0_25, %c0_26, %c0_27], %36 {strides = array<i32>} : memref<1x1x128xf32, #tpu.memory_space<vmem>>, vector<1x1x128xf32>,
    } else {
    }
    return
  }
  func.func @transform_0(%arg0: i32, %arg1: i32) -> (i32, i32, i32) {
    %c0_i32 = arith.constant 0 : i32
    %c0_i32_0 = arith.constant 0 : i32
    return %arg0, %arg1, %c0_i32 : i32, i32, i32
  }
  func.func @transform_1(%arg0: i32, %arg1: i32) -> (i32, i32, i32) {
    %c0_i32 = arith.constant 0 : i32
    %c0_i32_0 = arith.constant 0 : i32
    return %arg0, %arg1, %c0_i32 : i32, i32, i32
  }
  func.func @transform_2(%arg0: i32, %arg1: i32) -> (i32, i32, i32) {
    %c0_i32 = arith.constant 0 : i32
    %c0_i32_0 = arith.constant 0 : i32
    %c0_i32_1 = arith.constant 0 : i32
    return %arg0, %c0_i32, %c0_i32_0 : i32, i32, i32
  }
}

</mosaic_0001>

<bundles_post_ra>
// kernel: tpu_custom_call.1
= control target key start
LH: loop header
LB: loop body
LE: loop exit
PB: predicated region body
PF: predicated region fallthrough
CT: control target
= control target key end

     0   :  { %7 = vsyncpa [#allocation5], 0  ;;  %s792_s0 = inlined_call_operand.hbm [shape: f32[2,8,128], index: 0, kind: input, shape index: {}]   ;;  %s793_s1 = inlined_call_operand.hbm [shape: f32[2,8,128], index: 1, kind: input, shape index: {}]   ;;  %s794_s2 = inlined_call_operand.hbm [shape: f32[2,1,128], index: 2, kind: output, shape index: {}]  }
   0x1   :  { %9 = vsyncpa [#allocation5 + $0x1], 0 }
   0x2   :  { %10 = vsyncpa [#allocation8], 0 }
   0x3   :  { %12 = vsyncpa [#allocation8 + $0x1], 0 }
   0x4   :  { %13 = vsyncpa [#allocation6], 0 }
   0x5   :  { %15 = vsyncpa [#allocation6 + $0x1], 0  ;;  %s624_s9 = smov 0   ;;  %s626_s10 = smov 0  }
   0x6   :  { %s628_s11 = smov 0   ;;  %s630_s12 = smov 0  }
   0x7   :  { %s632_s13 = smov 0   ;;  %s634_s14 = smov 0  }
   0x8 LB: > { %s375_s15 = sadd.s32 4294967295, %s604_s14   ;;  %s376_s16 = sadd.s32 4294967294, %s604_s14   ;;  %s604_s14 = sphi %s634_s14, %s21_s14   ;;  %s600_s13 = sphi %s632_s13, %s806_s13   ;;  %s596_s12 = sphi %s630_s12, %s805_s12   ;;  %s592_s11 = sphi %s628_s11, %s804_s11   ;;  %s588_s10 = sphi %s626_s10, %s803_s10   ;;  %s584_s9 = sphi %s624_s9, %s802_s9  }
   0x9   : > { %s33_s17 = sadd.s32 1, %s600_s13  ;;  %s42_s18 = sadd.s32 1, %s592_s11 }
   0xa   : > { %p35_p0 = scmp.ge.s32.totalorder %s33_s17, 2  ;;  %p49_p1 = scmp.ne.s32.totalorder %s592_s11, %s588_s10 }
   0xb   : > { %p50_p2 = scmp.eq.s32.totalorder %s604_s14, 0  ;;  %p55_p3 = scmp.ne.s32.totalorder %s588_s10, %s584_s9 }
   0xc   : > { %s808_s17 = smov (%p35_p0, %s33_s17), 0  ;;  %p56_p5 = scmp.eq.s32.totalorder %s375_s15, 0 }
   0xd   : > { %p665_p4 = por %p50_p2, %p49_p1  ;;  %s37_s20 = ssub.s32 %s600_s13, %s808_s17 }
   0xe   : > { %p107_p6 = scmp.eq.s32.totalorder %s375_s15, 1  ;;  %p40_p7 = scmp.eq.s32.totalorder %s37_s20, 0 }
   0xf   : > { %p671_p8 = por %p56_p5, %p55_p3  ;;  %p113_p10 = scmp.eq.s32.totalorder %s376_s16, 1 }
  0x10   : > { %p675_p9 = por %p107_p6, %p49_p1  ;;  %p412_p13 = scmp.lt.s32.totalorder %s604_s14, 2 }
  0x11   : > { %s680_s23 = scalar_select %p40_p7, %s592_s11, %s42_s18  }
  0x12   : > { %p682_p11 = por %p113_p10, %p55_p3  ;;  %s689_s25 = sand.u32 1, %s592_s11  }
  0x13   : > { %s379_s26 = sshll.u32 %s689_s25, 3  ;;  %s380_s27 = sshll.u32 %s600_s13, 7 }
  0x14   : > { %s143_s30 = scalar_lea.hbm %s792_s0, %s380_s27  ;;  %s137_s3 = scalar_lea.vmem [#allocation4], %s379_s26 }
  0x15   : > { %s145_s4 = sshll.u32 %s137_s3, 4  ;;  %p698_p0 = pnand %p412_p13, %p665_p4  ;;  %s146_s4 = int_to_ptr.vmem [resolvable:$true] %s145_s4 }
  0x16   : > { %p383_p1 = scmp.ge.s32.totalorder %s604_s14, 1  ;;  %p169_p2 = scmp.lt.s32.totalorder %s604_s14, 3 }
  0x17   : > { %s134_s6 = scalar_lea.sflag [#allocation5], %s689_s25  ;;  %p466_p3 = pneg %p698_p0 }
  0x18   : > { %s477_s7 = scalar_lea.vmem %s146_s4, 128  ;;  %s606_s8 = smov [#allocation4]  }
  0x19   : > { %p478_p5 = scmp.ne.s32.totalorder %s146_s4, %s477_s7  ;;  %s482_s15 = sshll.u32 %s606_s8, 4  ;;  %s483_s15 = int_to_ptr.vmem [resolvable:$false] %s482_s15 }
  0x1a   : > { %s484_s16 = scalar_lea.vmem %s483_s15, 256  ;;  %p485_p4 = scmp.lt.s32.totalorder %s146_s4, %s483_s15 }
  0x1b   : > { %p480_p6 = pnand %p478_p5, %p466_p3  ;;  %p486_p10 = scmp.lt.s32.totalorder %s484_s16, %s477_s7 }
  0x1d   : > { %p481_p7 = pneg %p480_p6  ;;  %p487_p13 = por %p486_p10, %p485_p4 }
  0x1f   : > { %p488_p12 = pnand %p487_p13, %p481_p7 }
  0x21   : > { %491 = shalt.err (!%p488_p12)
}
  0x22   : > { %404 = dma.hbm_to_vmem [thread:$0]  (!%p698_p0), %s143_s30, 128, %s146_s4, %s134_s6  }
  0x23   : > { %p716_p5 = pnand %p383_p1, %p169_p2  ;;  %s162_s28 = scalar_lea.hbm %s793_s1, %s380_s27 }
  0x24   : > { %s156_s29 = scalar_lea.vmem [#allocation7], %s379_s26  ;;  %s153_s7 = scalar_lea.sflag [#allocation8], %s689_s25 }
  0x25   : > { %s164_s3 = sshll.u32 %s156_s29, 4  ;;  %s607_s30 = smov [#allocation7]   ;;  %s165_s3 = int_to_ptr.vmem [resolvable:$true] %s164_s3 }
  0x26   : > { %s505_s8 = scalar_lea.vmem %s165_s3, 128  ;;  %s510_s4 = sshll.u32 %s607_s30, 4  ;;  %s511_s4 = int_to_ptr.vmem [resolvable:$false] %s510_s4 }
  0x27   : > { %p506_p12 = scmp.ne.s32.totalorder %s165_s3, %s505_s8  ;;  %s512_s6 = scalar_lea.vmem %s511_s4, 256 }
  0x28   : > { %p513_p1 = scmp.lt.s32.totalorder %s165_s3, %s511_s4  ;;  %p514_p2 = scmp.lt.s32.totalorder %s512_s6, %s505_s8 }
  0x29   : > { %p508_p6 = pnand %p506_p12, %p466_p3 }
  0x2a   : > { %p515_p4 = por %p514_p2, %p513_p1 }
  0x2b   : > { %p509_p7 = pneg %p508_p6 }
  0x2d   : > { %p516_p10 = pnand %p515_p4, %p509_p7 }
  0x2f   : > { %519 = shalt.err (!%p516_p10)
}
  0x30   : > { %407 = dma.hbm_to_vmem [thread:$0]  (!%p698_p0), %s162_s28, 128, %s165_s3, %s153_s7  }
  0x31   : > { %173 = sbr.rel (%p716_p5) target bundleno = 349 (0x15d), region = 28  ;;  %s732_s25 = sand.u32 (!%p716_p5), 1, %s588_s10  }
  0x32   : > { %s384_s26 = sshll.u32 (!%p716_p5), %s732_s25, 3  ;;  %s176_s27 = scalar_lea.sflag (!%p716_p5), [#allocation5], %s732_s25 }
  0x33   : > { %s179_s15 = scalar_lea.vmem (!%p716_p5), [#allocation4], %s384_s26 }
  0x36   : > { %571 = dma.done.wait (%p671_p8), %s176_s27, 128  }
  0x37   : > { %573 = vsyncadd (%p671_p8), %s176_s27, 4294967168  ;;  %s185_s5 = scalar_lea.sflag [#allocation8], %s732_s25  ;;  %s188_s16 = scalar_lea.vmem [#allocation7], %s384_s26 }
  0x38   : > { %575 = dma.done.wait (%p671_p8), %s185_s5, 128  }
  0x39   : > { %577 = vsyncadd (%p671_p8), %s185_s5, 4294967168  ;;  %v219_v0 = vld [vmem:[%s179_s15] sm:$0xff]  ;;  %v220_v1 = vld [vmem:[%s188_s16] sm:$0xff]  ;;  %s386_s28 = sshll.u32 %s596_s12, 4  ;;  %s212_s3 = scalar_lea.vmem [#allocation9], %s732_s25 }
  0x3a   : > { %v222_v2 = vmul.f32 %v220_v1, %v219_v0  ;;  %v227_v3 = vadd.f32 %v220_v1, %v219_v0  ;;  %s276_s7 = sshll.u32 %s212_s3, 4  ;;  %s750_s26 = scalar_lea.hbm %s794_s2, %s386_s28  ;;  %s277_s7 = int_to_ptr.vmem [resolvable:$true] %s276_s7 }
  0x3b   : > { %s264_s27 = scalar_lea.sflag [#allocation6], %s732_s25  ;;  %s520_s15 = scalar_lea.vmem %s277_s7, 16 }
  0x3c   : > { %235 = vadd.xlane.f32.xlu0 %v222_v2  ;;  %p521_p8 = scmp.ne.s32.totalorder %s277_s7, %s520_s15  ;;  %s608_s12 = smov [#allocation9]  }
  0x3d   : > { %s524_s5 = sshll.u32 %s608_s12, 4  ;;  %s525_s5 = int_to_ptr.vmem [resolvable:$false] %s524_s5 }
  0x3e   : > { %p522_p0 = pnand %p521_p8, %p675_p9  ;;  %s526_s16 = scalar_lea.vmem %s525_s5, 32 }
  0x3f   : > { %p527_p13 = scmp.lt.s32.totalorder %s277_s7, %s525_s5  ;;  %p528_p5 = scmp.lt.s32.totalorder %s526_s16, %s520_s15 }
  0x40   : > { %245 = vadd.xlane.f32.xlu0 %v227_v3  ;;  %p523_p3 = pneg %p522_p0 }
  0x41   : > { %p529_p12 = por %p528_p5, %p527_p13 }
  0x43   : > { %p530_p6 = pnand %p529_p12, %p523_p3 }
  0xc5   : > { %v236_v4 = vpop.xlane.xlu0 %235 }
  0xc6   : > { %v237_v5 = vrot.slane %v236_v4, 4 }
  0xc8   : > { %v238_v6 = vadd.f32 %v237_v5, %v236_v4 }
  0xc9   : > { %v246_v7 = vpop.xlane.xlu0 %245 }
  0xca   : > { %v239_v8 = vrot.slane %v238_v6, 2  ;;  %v247_v9 = vrot.slane %v246_v7, 4 }
  0xcc   : > { %v248_v10 = vadd.f32 %v247_v9, %v246_v7  ;;  %v240_v11 = vadd.f32 %v239_v8, %v238_v6 }
  0xce   : > { %v249_v12 = vrot.slane %v248_v10, 2  ;;  %v241_v13 = vrot.slane %v240_v11, 1 }
  0xd0   : > { %v250_v14 = vadd.f32 %v249_v12, %v248_v10  ;;  %v242_v15 = vadd.f32 %v241_v13, %v240_v11 }
  0xd2   : > { %389 = vpush %v242_v15  ;;  %v251_v16 = vrot.slane %v250_v14, 1 }
  0xd4   : > { %v252_v17 = vadd.f32 %v251_v16, %v250_v14 }
  0xd6   : > { %391 = vpush %v252_v17 }
 0x103   : > { %s390_s21 = spop %389 }
 0x104   : > { %s254_s29 = sadd.f32 1.0, %s390_s21 }
 0x107   : > { %s392_s18 = spop %391 }
 0x108   : > { %s255_s19 = ssub.f32 %s392_s18, %s390_s21 }
 0x10a   : > { %s256_s20 = sadd.f32 1.0, %s255_s19 }
 0x10c   : > { %v257_v18 = vstv %s256_s20 }
 0x10d   : > { %462 = vrcp.f32 %v257_v18 }
 0x11a   : > { %v463_v19 = vpop.eup %462 }
 0x11b   : > { %393 = vpush %v463_v19 }
 0x14c   : > { %s394_s8 = spop %393 }
 0x14d   : > { %s260_s30 = smul.f32 %s394_s8, %s254_s29 }
 0x14f   : > { %v261_v20 = vstv %s260_s30 }
 0x150   : > { %262 = vst [vmem:[%s212_s3] sm:$0x1] %v261_v20 }
 0x151   : > { %533 = shalt.err (!%p530_p6)
}
 0x152   : > { %s534_s21 = scalar_lea.hbm %s750_s26, 16  ;;  %s538_s19 = scalar_lea.hbm %s794_s2, 32 }
 0x153   : > { %p535_p7 = scmp.ne.s32.totalorder %s750_s26, %s534_s21  ;;  %p539_p4 = scmp.lt.s32.totalorder %s750_s26, %s794_s2 }
 0x154   : > { %p540_p10 = scmp.lt.s32.totalorder %s538_s19, %s534_s21 }
 0x155   : > { %p536_p1 = pnand %p535_p7, %p675_p9 }
 0x156   : > { %p541_p8 = por %p540_p10, %p539_p4 }
 0x157   : > { %p537_p2 = pneg %p536_p1 }
 0x159   : > { %p542_p0 = pnand %p541_p8, %p537_p2 }
 0x15b   : > { %545 = shalt.err (!%p542_p0)
}
 0x15c   : > { %399 = dma.vmem_to_hbm [thread:$0]  (%p675_p9), %s277_s7, 16, %s750_s26, %s264_s27  }
 0x15d PF: > { %s288_s29 = sand.u32 1, %s584_s9   ;;  %p801_p3 = scmp.ge.s32.totalorder %s604_s14, 2 }
 0x15e   : > { %s289_s3 = scalar_lea.sflag [#allocation6], %s288_s29 }
 0x15f   : > { %p409_p13 = pnand %p801_p3, %p682_p11 }
 0x161   : > { %p410_p5 = pneg %p409_p13 }
 0x163   : > { %579 = dma.done.wait (%p410_p5), %s289_s3, 16  }
 0x164   : > { %581 = vsyncadd (%p410_p5), %s289_s3, 4294967280  ;;  %s21_s14 = sadd.s32 1, %s604_s14   ;;  %s802_s9 = smov %s588_s10 }
 0x165   : > { %p18_p12 = scmp.ge.s32.totalorder %s21_s14, 4   ;;  %s803_s10 = smov %s592_s11 }
 0x166   : > { %s804_s11 = smov %s680_s23  ;;  %s805_s12 = smov %s600_s13 }
 0x167   : > { %s806_s13 = smov %s808_s17  ;;  %20 = sbr.rel (!%p18_p12) target bundleno = 8 (0x8), region = 94 }
 0x16c   :  { %293 = vsyncpa [#allocation5], 1 }
 0x16d   :  { %295 = vsyncpa [#allocation5 + $0x1], 1 }
 0x16e   :  { %296 = vsyncpa [#allocation8], 1 }
 0x16f   :  { %298 = vsyncpa [#allocation8 + $0x1], 1 }
 0x170   :  { %299 = vsyncpa [#allocation6], 1 }
 0x171   :  { %301 = vsyncpa [#allocation6 + $0x1], 1 }

</bundles_post_ra>
